<compile_context>
chip_gen: v5e
topology: v5e:2x2
jax: 0.10.0
libtpu: 0.0.40
codegen_flags: <defaults>
</compile_context>

<pallas_src>
import jax
import jax.numpy as jnp
from jax.experimental import pallas as pl
from jax.experimental.pallas import tpu as pltpu

LN_EPS = 1e-5  # torch.nn.LayerNorm default eps


def _round_up(x, m):
    return ((x + m - 1) // m) * m


def _layernorm(x, gamma, beta):
    mean = jnp.mean(x, axis=-1, keepdims=True)
    var = jnp.mean((x - mean) ** 2, axis=-1, keepdims=True)   # biased var (torch LayerNorm)
    return (x - mean) * jax.lax.rsqrt(var + LN_EPS) * gamma + beta


# -----------------------------------------------------------------------------
# Kernel
# -----------------------------------------------------------------------------
def critic_kernel(jobs_ref, clu_ref, gpu_ref,
                  wjob_ref, wclu_ref, wgpu_ref, mavg_ref, w1_ref, rows_ref,
                  out_ref):
    f32 = jnp.float32
    Fj = wjob_ref.shape[1]          # 16 * max_jobs
    Fc = wclu_ref.shape[1]          # 16
    Fg = wgpu_ref.shape[1]          # 32
    hidden = w1_ref.shape[1]
    cd = w1_ref.dtype               # MXU operand dtype (f32 or bf16)

    # ---- encoders: three small MXU dots, f32 accumulation --------------------
    zj = (jnp.dot(jobs_ref[...], wjob_ref[...], preferred_element_type=f32)
          + rows_ref[pl.ds(0, 1), pl.ds(0, Fj)])                       # (Bt, Fj)
    zc = (jnp.dot(clu_ref[...], wclu_ref[...], preferred_element_type=f32)
          + rows_ref[pl.ds(0, 1), pl.ds(Fj, Fc)])                      # (Bt, Fc)
    zg = (jnp.dot(gpu_ref[...], wgpu_ref[...], preferred_element_type=f32)
          + rows_ref[pl.ds(0, 1), pl.ds(Fj + Fc, Fg)])                 # (Bt, Fg)

    # ---- per-job LayerNorm over 16-lane chunks (lane-dense averaging matmul) --
    mean_j = jnp.dot(zj.astype(cd), mavg_ref[...], preferred_element_type=f32)
    dj = zj - mean_j
    var_j = jnp.dot((dj * dj).astype(cd), mavg_ref[...], preferred_element_type=f32)
    feat_j = jnp.maximum(
        dj * jax.lax.rsqrt(var_j + LN_EPS)
        * rows_ref[pl.ds(1, 1), pl.ds(0, Fj)]
        + rows_ref[pl.ds(2, 1), pl.ds(0, Fj)], 0.0)                    # (Bt, Fj)

    # ---- cluster LayerNorm: single 16-lane group -> plain XLU lane reduce ------
    mean_c = jnp.mean(zc, axis=-1, keepdims=True)
    dc = zc - mean_c
    var_c = jnp.mean(dc * dc, axis=-1, keepdims=True)
    feat_c = jnp.maximum(
        dc * jax.lax.rsqrt(var_c + LN_EPS)
        * rows_ref[pl.ds(1, 1), pl.ds(Fj, Fc)]
        + rows_ref[pl.ds(2, 1), pl.ds(Fj, Fc)], 0.0)                   # (Bt, Fc)

    # ---- gpu encoder: ReLU only (no LayerNorm in the reference model) ----------
    feat_g = jnp.maximum(zg, 0.0)                                      # (Bt, Fg)

    # ---- value head layer 1: W1 split into its three row blocks ----------------
    h = (jnp.dot(feat_j.astype(cd), w1_ref[pl.ds(0, Fj), :],
                 preferred_element_type=f32)
         + jnp.dot(feat_c.astype(cd), w1_ref[pl.ds(Fj, Fc), :],
                   preferred_element_type=f32)
         + jnp.dot(feat_g.astype(cd), w1_ref[pl.ds(Fj + Fc, Fg), :],
                   preferred_element_type=f32)
         + rows_ref[pl.ds(3, 1), pl.ds(0, hidden)])
    h = jnp.maximum(h, 0.0)                                            # (Bt, hidden)

    # ---- value head layer 2 (N=1): VPU multiply + lane reduce, skip the MXU ----
    v = (jnp.sum(h * rows_ref[pl.ds(4, 1), pl.ds(0, hidden)],
                 axis=-1, keepdims=True)
         + rows_ref[pl.ds(5, 1), pl.ds(0, 1)])                         # (Bt, 1)

    out_ref[...] = v.astype(out_ref.dtype)


# -----------------------------------------------------------------------------
# One-time parameter fusion (hoisted out of the per-forward-call path)
# -----------------------------------------------------------------------------
def fuse_critic_params(params, max_jobs, *, compute_dtype=jnp.float32):
    f32 = jnp.float32
    cd = compute_dtype

    w_job = params["w_job"].astype(f32)              # (5, 16)
    w_clu = params["w_clu"].astype(f32)              # (num_nodes, 16)
    w_gpu = params["w_gpu"].astype(f32)              # (num_nodes*num_gpus, 32)
    w1 = params["w1"].astype(f32)                    # (F, hidden)

    Dj, Fj = 5 * max_jobs, 16 * max_jobs
    Dc, Fc = w_clu.shape
    Dg, Fg = w_gpu.shape
    hidden = w1.shape[1]
    F = Fj + Fc + Fg
    W = max(F, hidden)

    # pad contraction dims to sublane multiples (zero rows -> results unchanged)
    Dj_p, Dc_p, Dg_p = (_round_up(d, 8) for d in (Dj, Dc, Dg))

    wjob_bd = jnp.kron(jnp.eye(max_jobs, dtype=f32), w_job)            # (Dj, Fj)
    wjob_bd = jnp.pad(wjob_bd, ((0, Dj_p - Dj), (0, 0)))
    wclu_p = jnp.pad(w_clu, ((0, Dc_p - Dc), (0, 0)))
    wgpu_p = jnp.pad(w_gpu, ((0, Dg_p - Dg), (0, 0)))

    # per-16-lane-chunk averaging matrix for the job LayerNorm (lane-dense, no reshapes)
    mavg = jnp.kron(jnp.eye(max_jobs, dtype=f32), jnp.ones((16, 16), f32) / 16.0)

    # stacked f32 row vectors: one resident (8, W) VMEM tile instead of six tiny DMAs
    #   row 0: encoder biases [b_job x max_jobs | b_clu | b_gpu]   (F lanes)
    #   row 1: LN gamma       [g_job x max_jobs | g_clu]           (Fj+Fc lanes)
    #   row 2: LN beta        [beta_job x max_jobs | beta_clu]     (Fj+Fc lanes)
    #   row 3: b1 (hidden)   row 4: w2 (hidden)   row 5,[0]: b2
    rows = jnp.zeros((8, W), f32)
    rows = rows.at[0:1, :F].set(jnp.concatenate(
        [jnp.tile(params["b_job"], (1, max_jobs)), params["b_clu"],
         params["b_gpu"]], axis=1).astype(f32))
    rows = rows.at[1:2, :Fj + Fc].set(jnp.concatenate(
        [jnp.tile(params["g_job"], (1, max_jobs)), params["g_clu"]],
        axis=1).astype(f32))
    rows = rows.at[2:3, :Fj + Fc].set(jnp.concatenate(
        [jnp.tile(params["beta_job"], (1, max_jobs)), params["beta_clu"]],
        axis=1).astype(f32))
    rows = rows.at[3:4, :hidden].set(params["b1"].astype(f32))
    rows = rows.at[4:5, :hidden].set(params["w2"].reshape(1, hidden).astype(f32))
    rows = rows.at[5, 0].set(params["b2"].reshape(()).astype(f32))

    return {
        "wjob": wjob_bd.astype(cd), "wclu": wclu_p.astype(cd),
        "wgpu": wgpu_p.astype(cd), "mavg": mavg.astype(cd),
        "w1": w1.astype(cd), "rows": rows,
        "max_jobs": max_jobs, "dims": (Dj, Dc, Dg, Dj_p, Dc_p, Dg_p),
    }


# -----------------------------------------------------------------------------
# Forward wrapper
# -----------------------------------------------------------------------------
def critic_forward(fused, jobs, cluster, gpu_left, *, block_b=1024):
    f32 = jnp.float32
    cd = fused["w1"].dtype
    Dj, Dc, Dg, Dj_p, Dc_p, Dg_p = fused["dims"]
    B = jobs.shape[0]

    jobs2d = jobs.astype(cd).reshape(B, Dj)
    clu2d = cluster.astype(cd).reshape(B, Dc)
    gpu2d = gpu_left.astype(cd).reshape(B, Dg)

    # ---- batch tiling: multiple-of-8 tiles; >= 2 grid steps when possible ------
    block_b = _round_up(max(block_b, 8), 8)
    if B > block_b:
        Bt = block_b
    else:
        Bt = min(_round_up(max(1, (B + 1) // 2), 8), block_b)
    Bp = _round_up(B, Bt)

    def _pad(x, dp):
        db, dd = Bp - x.shape[0], dp - x.shape[1]
        return jnp.pad(x, ((0, db), (0, dd))) if (db or dd) else x

    jobs2d = _pad(jobs2d, Dj_p)
    clu2d = _pad(clu2d, Dc_p)
    gpu2d = _pad(gpu2d, Dg_p)

    def _const_spec(shape):
        return pl.BlockSpec(shape, lambda b, _s=shape: (0,) * len(_s))

    out = pl.pallas_call(
        critic_kernel,
        out_shape=jax.ShapeDtypeStruct((Bp, 1), f32),
        grid=(Bp // Bt,),
        in_specs=[
            pl.BlockSpec((Bt, Dj_p), lambda b: (b, 0)),    # jobs tile    (batch grid)
            pl.BlockSpec((Bt, Dc_p), lambda b: (b, 0)),    # cluster tile
            pl.BlockSpec((Bt, Dg_p), lambda b: (b, 0)),    # gpu tile
            _const_spec(fused["wjob"].shape),              # resident weights
            _const_spec(fused["wclu"].shape),
            _const_spec(fused["wgpu"].shape),
            _const_spec(fused["mavg"].shape),
            _const_spec(fused["w1"].shape),
            _const_spec(fused["rows"].shape),
        ],
        out_specs=pl.BlockSpec((Bt, 1), lambda b: (b, 0)), # narrow (Bt, 1) writeback
        compiler_params=pltpu.CompilerParams(
            dimension_semantics=("parallel",)),            # batch splits over TCs (v7x)
    )(jobs2d, clu2d, gpu2d, fused["wjob"], fused["wclu"], fused["wgpu"],
      fused["mavg"], fused["w1"], fused["rows"])

    return out[:B]


# -----------------------------------------------------------------------------
# Reference model & params
# -----------------------------------------------------------------------------
def init_params(key, num_nodes, num_gpus, max_jobs, hidden_dim):
    ng = num_nodes * num_gpus
    in_dim = 16 * max_jobs + 16 + 32
    ks = jax.random.split(key, 8)
    f32 = jnp.float32
    return {
        # weights stored as (in_features, out_features)
        "w_job": jax.random.normal(ks[0], (5, 16), f32) * 0.1,
        "b_job": jnp.zeros((1, 16), f32),
        "g_job": jnp.ones((1, 16), f32),
        "beta_job": jnp.zeros((1, 16), f32),
        "w_clu": jax.random.normal(ks[1], (num_nodes, 16), f32) * 0.1,
        "b_clu": jnp.zeros((1, 16), f32),
        "g_clu": jnp.ones((1, 16), f32),
        "beta_clu": jnp.zeros((1, 16), f32),
        "w_gpu": jax.random.normal(ks[2], (ng, 32), f32) * 0.1,
        "b_gpu": jax.random.normal(ks[3], (1, 32), f32) * 0.01,
        "w1": jax.random.normal(ks[4], (in_dim, hidden_dim), f32) * 0.1,
        "b1": jax.random.normal(ks[5], (1, hidden_dim), f32) * 0.01,
        "w2": jax.random.normal(ks[6], (hidden_dim, 1), f32) * 0.1,
        "b2": jax.random.normal(ks[7], (1, 1), f32) * 0.01,
    }


def critic_reference(params, jobs, cluster, gpu_left, max_jobs):
    """Pure-JAX mirror of the PyTorch forward."""
    B = jobs.shape[0]
    jz = jobs.astype(jnp.float32).reshape(-1, 5) @ params["w_job"] + params["b_job"]
    jf = jnp.maximum(_layernorm(jz, params["g_job"], params["beta_job"]), 0.0)
    jf = jf.reshape(B, max_jobs * 16)
    cz = cluster.astype(jnp.float32) @ params["w_clu"] + params["b_clu"]
    cf = jnp.maximum(_layernorm(cz, params["g_clu"], params["beta_clu"]), 0.0)
    gz = gpu_left.astype(jnp.float32).reshape(B, -1) @ params["w_gpu"] + params["b_gpu"]
    gf = jnp.maximum(gz, 0.0)
    x = jnp.concatenate([jf, cf, gf], axis=1)
    h = jnp.maximum(x @ params["w1"] + params["b1"], 0.0)
    return h @ params["w2"] + params["b2"]


if __name__ == "__main__":
    num_nodes, num_gpus, max_jobs, hidden_dim = 4, 8, 8, 64
    B = 2

    key = jax.random.PRNGKey(0)
    kp, kj, kc, kg = jax.random.split(key, 4)
    params = init_params(kp, num_nodes, num_gpus, max_jobs, hidden_dim)

    jobs = jax.random.normal(kj, (B, max_jobs, 5), jnp.float32)
    cluster = jax.random.normal(kc, (B, num_nodes), jnp.float32)
    gpu_left = jax.random.normal(kg, (B, num_nodes, num_gpus), jnp.float32)

    ref = critic_reference(params, jobs, cluster, gpu_left, max_jobs)

    # f32 path (tight tolerance)
    fused_f32 = fuse_critic_params(params, max_jobs)                # built once, reused
    out = critic_forward(fused_f32, jobs, cluster, gpu_left)
    out = jax.block_until_ready(out)
    assert out.shape == (B, 1)
    assert jnp.allclose(out, ref, atol=1e-4, rtol=1e-4), (out, ref)

    # bf16 MXU-operand / f32-accumulate path (loose tolerance)
    fused_bf16 = fuse_critic_params(params, max_jobs, compute_dtype=jnp.bfloat16)
    out_bf16 = critic_forward(fused_bf16, jobs, cluster, gpu_left)
    out_bf16 = jax.block_until_ready(out_bf16)
    assert jnp.allclose(out_bf16, ref, atol=1e-1, rtol=1e-1), (out_bf16, ref)

    print("KERNEL_OK")
</pallas_src>

<mosaic_0001>
module attributes {stable_mosaic.version = 11 : i64} {
  func.func @critic_kernel(%arg0: i32, %arg1: memref<8x40xf32, #tpu.memory_space<vmem>>, %arg2: memref<8x8xf32, #tpu.memory_space<vmem>>, %arg3: memref<8x32xf32, #tpu.memory_space<vmem>>, %arg4: memref<40x128xf32, #tpu.memory_space<vmem>>, %arg5: memref<8x16xf32, #tpu.memory_space<vmem>>, %arg6: memref<32x32xf32, #tpu.memory_space<vmem>>, %arg7: memref<128x128xf32, #tpu.memory_space<vmem>>, %arg8: memref<176x64xf32, #tpu.memory_space<vmem>>, %arg9: memref<8x176xf32, #tpu.memory_space<vmem>>, %arg10: memref<8x1xf32, #tpu.memory_space<vmem>>) attributes {dimension_semantics = [#tpu.dimension_semantics<parallel>], iteration_bounds = array<i64: 1>, scalar_prefetch = 0 : i64, scratch_operands = 0 : i64, tpu.core_type = #tpu.core_type<tc>, window_params = [{transform_indices = @transform_0, window_bounds = array<i64: 8, 40>}, {transform_indices = @transform_1, window_bounds = array<i64: 8, 8>}, {transform_indices = @transform_2, window_bounds = array<i64: 8, 32>}, {pipeline_mode = #tpu.pipeline_mode<synchronous>, transform_indices = @transform_3, window_bounds = array<i64: 40, 128>}, {pipeline_mode = #tpu.pipeline_mode<synchronous>, transform_indices = @transform_4, window_bounds = array<i64: 8, 16>}, {pipeline_mode = #tpu.pipeline_mode<synchronous>, transform_indices = @transform_5, window_bounds = array<i64: 32, 32>}, {pipeline_mode = #tpu.pipeline_mode<synchronous>, transform_indices = @transform_6, window_bounds = array<i64: 128, 128>}, {pipeline_mode = #tpu.pipeline_mode<synchronous>, transform_indices = @transform_7, window_bounds = array<i64: 176, 64>}, {pipeline_mode = #tpu.pipeline_mode<synchronous>, transform_indices = @transform_8, window_bounds = array<i64: 8, 176>}, {transform_indices = @transform_9, window_bounds = array<i64: 8, 1>}]} {
    %c0 = arith.constant 0 : index
    %c0_0 = arith.constant 0 : index
    %0 = vector.load %arg1[%c0, %c0_0] : memref<8x40xf32, #tpu.memory_space<vmem>>, vector<8x40xf32>
    %c0_1 = arith.constant 0 : index
    %c0_2 = arith.constant 0 : index
    %1 = vector.load %arg4[%c0_1, %c0_2] : memref<40x128xf32, #tpu.memory_space<vmem>>, vector<40x128xf32>
    %cst = arith.constant dense<0.000000e+00> : vector<8x128xf32>
    %2 = tpu.matmul %0, %1, %cst {dimension_numbers = #tpu.dot_dimension_numbers<[1], [0], [0], [1], [0, 0, 1, 1], [], []>} : vector<8x40xf32>, vector<40x128xf32>, vector<8x128xf32> -> vector<8x128xf32>
    %c0_3 = arith.constant 0 : index
    %c0_4 = arith.constant 0 : index
    %3 = vector.load %arg9[%c0_3, %c0_4] : memref<8x176xf32, #tpu.memory_space<vmem>>, vector<1x128xf32>
    %4 = vector.broadcast %3 : vector<1x128xf32> to vector<8x128xf32>
    %5 = arith.addf %2, %4 : vector<8x128xf32>
    %c0_5 = arith.constant 0 : index
    %c0_6 = arith.constant 0 : index
    %6 = vector.load %arg2[%c0_5, %c0_6] : memref<8x8xf32, #tpu.memory_space<vmem>>, vector<8x8xf32>
    %c0_7 = arith.constant 0 : index
    %c0_8 = arith.constant 0 : index
    %7 = vector.load %arg5[%c0_7, %c0_8] : memref<8x16xf32, #tpu.memory_space<vmem>>, vector<8x16xf32>
    %cst_9 = arith.constant dense<0.000000e+00> : vector<8x16xf32>
    %8 = tpu.matmul %6, %7, %cst_9 {dimension_numbers = #tpu.dot_dimension_numbers<[1], [0], [0], [1], [0, 0, 1, 1], [], []>} : vector<8x8xf32>, vector<8x16xf32>, vector<8x16xf32> -> vector<8x16xf32>
    %c0_10 = arith.constant 0 : index
    %c128 = arith.constant 128 : index
    %9 = vector.load %arg9[%c0_10, %c128] : memref<8x176xf32, #tpu.memory_space<vmem>>, vector<1x16xf32>
    %10 = vector.broadcast %9 : vector<1x16xf32> to vector<8x16xf32>
    %11 = arith.addf %8, %10 : vector<8x16xf32>
    %c0_11 = arith.constant 0 : index
    %c0_12 = arith.constant 0 : index
    %12 = vector.load %arg3[%c0_11, %c0_12] : memref<8x32xf32, #tpu.memory_space<vmem>>, vector<8x32xf32>
    %c0_13 = arith.constant 0 : index
    %c0_14 = arith.constant 0 : index
    %13 = vector.load %arg6[%c0_13, %c0_14] : memref<32x32xf32, #tpu.memory_space<vmem>>, vector<32x32xf32>
    %cst_15 = arith.constant dense<0.000000e+00> : vector<8x32xf32>
    %14 = tpu.matmul %12, %13, %cst_15 {dimension_numbers = #tpu.dot_dimension_numbers<[1], [0], [0], [1], [0, 0, 1, 1], [], []>} : vector<8x32xf32>, vector<32x32xf32>, vector<8x32xf32> -> vector<8x32xf32>
    %c0_16 = arith.constant 0 : index
    %c144 = arith.constant 144 : index
    %15 = vector.load %arg9[%c0_16, %c144] : memref<8x176xf32, #tpu.memory_space<vmem>>, vector<1x32xf32>
    %16 = vector.broadcast %15 : vector<1x32xf32> to vector<8x32xf32>
    %17 = arith.addf %14, %16 : vector<8x32xf32>
    %c0_17 = arith.constant 0 : index
    %c0_18 = arith.constant 0 : index
    %18 = vector.load %arg7[%c0_17, %c0_18] : memref<128x128xf32, #tpu.memory_space<vmem>>, vector<128x128xf32>
    %cst_19 = arith.constant dense<0.000000e+00> : vector<8x128xf32>
    %19 = tpu.matmul %5, %18, %cst_19 {dimension_numbers = #tpu.dot_dimension_numbers<[1], [0], [0], [1], [0, 0, 1, 1], [], []>} : vector<8x128xf32>, vector<128x128xf32>, vector<8x128xf32> -> vector<8x128xf32>
    %20 = arith.subf %5, %19 : vector<8x128xf32>
    %21 = arith.mulf %20, %20 : vector<8x128xf32>
    %c0_20 = arith.constant 0 : index
    %c0_21 = arith.constant 0 : index
    %22 = vector.load %arg7[%c0_20, %c0_21] : memref<128x128xf32, #tpu.memory_space<vmem>>, vector<128x128xf32>
    %cst_22 = arith.constant dense<0.000000e+00> : vector<8x128xf32>
    %23 = tpu.matmul %21, %22, %cst_22 {dimension_numbers = #tpu.dot_dimension_numbers<[1], [0], [0], [1], [0, 0, 1, 1], [], []>} : vector<8x128xf32>, vector<128x128xf32>, vector<8x128xf32> -> vector<8x128xf32>
    %cst_23 = arith.constant 9.99999974E-6 : f32
    %24 = vector.broadcast %cst_23 : f32 to vector<8x128xf32>
    %25 = arith.addf %23, %24 : vector<8x128xf32>
    %26 = math.rsqrt %25 : vector<8x128xf32>
    %27 = arith.mulf %20, %26 : vector<8x128xf32>
    %c1 = arith.constant 1 : index
    %c0_24 = arith.constant 0 : index
    %28 = vector.load %arg9[%c1, %c0_24] : memref<8x176xf32, #tpu.memory_space<vmem>>, vector<1x128xf32>
    %29 = vector.broadcast %28 : vector<1x128xf32> to vector<8x128xf32>
    %30 = arith.mulf %27, %29 : vector<8x128xf32>
    %c2 = arith.constant 2 : index
    %c0_25 = arith.constant 0 : index
    %31 = vector.load %arg9[%c2, %c0_25] : memref<8x176xf32, #tpu.memory_space<vmem>>, vector<1x128xf32>
    %32 = vector.broadcast %31 : vector<1x128xf32> to vector<8x128xf32>
    %33 = arith.addf %30, %32 : vector<8x128xf32>
    %cst_26 = arith.constant 0.000000e+00 : f32
    %34 = vector.broadcast %cst_26 : f32 to vector<8x128xf32>
    %35 = arith.maximumf %33, %34 : vector<8x128xf32>
    %cst_27 = arith.constant dense<0.000000e+00> : vector<8xf32>
    %36 = vector.multi_reduction <add>, %11, %cst_27 [1] : vector<8x16xf32> to vector<8xf32>
    %37 = vector.shape_cast %36 : vector<8xf32> to vector<8x1xf32>
    %cst_28 = arith.constant 1.600000e+01 : f32
    %38 = vector.broadcast %cst_28 : f32 to vector<8x1xf32>
    %39 = arith.divf %37, %38 : vector<8x1xf32>
    %40 = vector.broadcast %39 : vector<8x1xf32> to vector<8x16xf32>
    %41 = arith.subf %11, %40 : vector<8x16xf32>
    %42 = arith.mulf %41, %41 : vector<8x16xf32>
    %cst_29 = arith.constant dense<0.000000e+00> : vector<8xf32>
    %43 = vector.multi_reduction <add>, %42, %cst_29 [1] : vector<8x16xf32> to vector<8xf32>
    %44 = vector.shape_cast %43 : vector<8xf32> to vector<8x1xf32>
    %cst_30 = arith.constant 1.600000e+01 : f32
    %45 = vector.broadcast %cst_30 : f32 to vector<8x1xf32>
    %46 = arith.divf %44, %45 : vector<8x1xf32>
    %cst_31 = arith.constant 9.99999974E-6 : f32
    %47 = vector.broadcast %cst_31 : f32 to vector<8x1xf32>
    %48 = arith.addf %46, %47 : vector<8x1xf32>
    %49 = math.rsqrt %48 : vector<8x1xf32>
    %50 = vector.broadcast %49 : vector<8x1xf32> to vector<8x16xf32>
    %51 = arith.mulf %41, %50 : vector<8x16xf32>
    %c1_32 = arith.constant 1 : index
    %c128_33 = arith.constant 128 : index
    %52 = vector.load %arg9[%c1_32, %c128_33] : memref<8x176xf32, #tpu.memory_space<vmem>>, vector<1x16xf32>
    %53 = vector.broadcast %52 : vector<1x16xf32> to vector<8x16xf32>
    %54 = arith.mulf %51, %53 : vector<8x16xf32>
    %c2_34 = arith.constant 2 : index
    %c128_35 = arith.constant 128 : index
    %55 = vector.load %arg9[%c2_34, %c128_35] : memref<8x176xf32, #tpu.memory_space<vmem>>, vector<1x16xf32>
    %56 = vector.broadcast %55 : vector<1x16xf32> to vector<8x16xf32>
    %57 = arith.addf %54, %56 : vector<8x16xf32>
    %cst_36 = arith.constant 0.000000e+00 : f32
    %58 = vector.broadcast %cst_36 : f32 to vector<8x16xf32>
    %59 = arith.maximumf %57, %58 : vector<8x16xf32>
    %cst_37 = arith.constant 0.000000e+00 : f32
    %60 = vector.broadcast %cst_37 : f32 to vector<8x32xf32>
    %61 = arith.maximumf %17, %60 : vector<8x32xf32>
    %c0_38 = arith.constant 0 : index
    %c0_39 = arith.constant 0 : index
    %62 = vector.load %arg8[%c0_38, %c0_39] : memref<176x64xf32, #tpu.memory_space<vmem>>, vector<128x64xf32>
    %cst_40 = arith.constant dense<0.000000e+00> : vector<8x64xf32>
    %63 = tpu.matmul %35, %62, %cst_40 {dimension_numbers = #tpu.dot_dimension_numbers<[1], [0], [0], [1], [0, 0, 1, 1], [], []>} : vector<8x128xf32>, vector<128x64xf32>, vector<8x64xf32> -> vector<8x64xf32>
    %c128_41 = arith.constant 128 : index
    %c0_42 = arith.constant 0 : index
    %64 = vector.load %arg8[%c128_41, %c0_42] : memref<176x64xf32, #tpu.memory_space<vmem>>, vector<16x64xf32>
    %cst_43 = arith.constant dense<0.000000e+00> : vector<8x64xf32>
    %65 = tpu.matmul %59, %64, %cst_43 {dimension_numbers = #tpu.dot_dimension_numbers<[1], [0], [0], [1], [0, 0, 1, 1], [], []>} : vector<8x16xf32>, vector<16x64xf32>, vector<8x64xf32> -> vector<8x64xf32>
    %66 = arith.addf %63, %65 : vector<8x64xf32>
    %c144_44 = arith.constant 144 : index
    %c0_45 = arith.constant 0 : index
    %67 = vector.load %arg8[%c144_44, %c0_45] : memref<176x64xf32, #tpu.memory_space<vmem>>, vector<32x64xf32>
    %cst_46 = arith.constant dense<0.000000e+00> : vector<8x64xf32>
    %68 = tpu.matmul %61, %67, %cst_46 {dimension_numbers = #tpu.dot_dimension_numbers<[1], [0], [0], [1], [0, 0, 1, 1], [], []>} : vector<8x32xf32>, vector<32x64xf32>, vector<8x64xf32> -> vector<8x64xf32>
    %69 = arith.addf %66, %68 : vector<8x64xf32>
    %c3 = arith.constant 3 : index
    %c0_47 = arith.constant 0 : index
    %70 = vector.load %arg9[%c3, %c0_47] : memref<8x176xf32, #tpu.memory_space<vmem>>, vector<1x64xf32>
    %71 = vector.broadcast %70 : vector<1x64xf32> to vector<8x64xf32>
    %72 = arith.addf %69, %71 : vector<8x64xf32>
    %cst_48 = arith.constant 0.000000e+00 : f32
    %73 = vector.broadcast %cst_48 : f32 to vector<8x64xf32>
    %74 = arith.maximumf %72, %73 : vector<8x64xf32>
    %c4 = arith.constant 4 : index
    %c0_49 = arith.constant 0 : index
    %75 = vector.load %arg9[%c4, %c0_49] : memref<8x176xf32, #tpu.memory_space<vmem>>, vector<1x64xf32>
    %76 = vector.broadcast %75 : vector<1x64xf32> to vector<8x64xf32>
    %77 = arith.mulf %74, %76 : vector<8x64xf32>
    %cst_50 = arith.constant dense<0.000000e+00> : vector<8xf32>
    %78 = vector.multi_reduction <add>, %77, %cst_50 [1] : vector<8x64xf32> to vector<8xf32>
    %79 = vector.shape_cast %78 : vector<8xf32> to vector<8x1xf32>
    %c5 = arith.constant 5 : index
    %c0_51 = arith.constant 0 : index
    %80 = vector.load %arg9[%c5, %c0_51] : memref<8x176xf32, #tpu.memory_space<vmem>>, vector<1x1xf32>
    %81 = vector.broadcast %80 : vector<1x1xf32> to vector<8x1xf32>
    %82 = arith.addf %79, %81 : vector<8x1xf32>
    %c0_52 = arith.constant 0 : index
    %c0_53 = arith.constant 0 : index
    %83 = vector.load %arg10[%c0_52, %c0_53] : memref<8x1xf32, #tpu.memory_space<vmem>>, vector<8x1xf32>
    tpu.vector_store %arg10[%c0_52, %c0_53], %82 {strides = array<i32>} : memref<8x1xf32, #tpu.memory_space<vmem>>, vector<8x1xf32>,
    return
  }
  func.func @transform_0(%arg0: i32) -> (i32, i32) {
    %c0_i32 = arith.constant 0 : i32
    %c0_i32_0 = arith.constant 0 : i32
    return %arg0, %c0_i32 : i32, i32
  }
  func.func @transform_1(%arg0: i32) -> (i32, i32) {
    %c0_i32 = arith.constant 0 : i32
    %c0_i32_0 = arith.constant 0 : i32
    return %arg0, %c0_i32 : i32, i32
  }
  func.func @transform_2(%arg0: i32) -> (i32, i32) {
    %c0_i32 = arith.constant 0 : i32
    %c0_i32_0 = arith.constant 0 : i32
    return %arg0, %c0_i32 : i32, i32
  }
  func.func @transform_3(%arg0: i32) -> (i32, i32) {
    %c0_i32 = arith.constant 0 : i32
    %c0_i32_0 = arith.constant 0 : i32
    %c0_i32_1 = arith.constant 0 : i32
    return %c0_i32, %c0_i32_0 : i32, i32
  }
  func.func @transform_4(%arg0: i32) -> (i32, i32) {
    %c0_i32 = arith.constant 0 : i32
    %c0_i32_0 = arith.constant 0 : i32
    %c0_i32_1 = arith.constant 0 : i32
    return %c0_i32, %c0_i32_0 : i32, i32
  }
  func.func @transform_5(%arg0: i32) -> (i32, i32) {
    %c0_i32 = arith.constant 0 : i32
    %c0_i32_0 = arith.constant 0 : i32
    %c0_i32_1 = arith.constant 0 : i32
    return %c0_i32, %c0_i32_0 : i32, i32
  }
  func.func @transform_6(%arg0: i32) -> (i32, i32) {
    %c0_i32 = arith.constant 0 : i32
    %c0_i32_0 = arith.constant 0 : i32
    %c0_i32_1 = arith.constant 0 : i32
    return %c0_i32, %c0_i32_0 : i32, i32
  }
  func.func @transform_7(%arg0: i32) -> (i32, i32) {
    %c0_i32 = arith.constant 0 : i32
    %c0_i32_0 = arith.constant 0 : i32
    %c0_i32_1 = arith.constant 0 : i32
    return %c0_i32, %c0_i32_0 : i32, i32
  }
  func.func @transform_8(%arg0: i32) -> (i32, i32) {
    %c0_i32 = arith.constant 0 : i32
    %c0_i32_0 = arith.constant 0 : i32
    %c0_i32_1 = arith.constant 0 : i32
    return %c0_i32, %c0_i32_0 : i32, i32
  }
  func.func @transform_9(%arg0: i32) -> (i32, i32) {
    %c0_i32 = arith.constant 0 : i32
    %c0_i32_0 = arith.constant 0 : i32
    return %arg0, %c0_i32 : i32, i32
  }
}

</mosaic_0001>

<bundles_post_ra>
// kernel: tpu_custom_call.1
= control target key start
LH: loop header
LB: loop body
LE: loop exit
PB: predicated region body
PF: predicated region fallthrough
CT: control target
= control target key end

     0   :  { %vm66_vm0 = vcmask 64512   ;;  %vm39_vm1 = vcmask 326656   ;;  %vm197_vm2 = vcmask 130048   ;;  %v353_v31 = vmov 16.0   ;;  %s602_s3 = inlined_call_operand.vmem [shape: f32[40,128], index: 3, kind: input, shape index: {}]   ;;  %s603_s4 = inlined_call_operand.vmem [shape: f32[8,16], index: 4, kind: input, shape index: {}]   ;;  %s604_s1 = inlined_call_operand.vmem [shape: f32[8,8], index: 1, kind: input, shape index: {}]   ;;  %s605_s6 = inlined_call_operand.vmem [shape: f32[128,128], index: 6, kind: input, shape index: {}]   ;;  %s606_s0 = inlined_call_operand.vmem [shape: f32[8,40], index: 0, kind: input, shape index: {}]   ;;  %s607_s8 = inlined_call_operand.vmem [shape: f32[8,176], index: 8, kind: input, shape index: {}]   ;;  %s608_s5 = inlined_call_operand.vmem [shape: f32[32,32], index: 5, kind: input, shape index: {}]   ;;  %s609_s2 = inlined_call_operand.vmem [shape: f32[8,32], index: 2, kind: input, shape index: {}]   ;;  %s610_s7 = inlined_call_operand.vmem [shape: f32[176,64], index: 7, kind: input, shape index: {}]   ;;  %s611_s9 = inlined_call_operand.vmem [shape: f32[8,1], index: 9, kind: output, shape index: {}]  }
   0x1   :  { %v37_v0 = vld [vmem:[%s602_s3 + $0x20] sm:$0xff]  ;;  %v36_v3 = vld [vmem:[%s602_s3 + $0x18] sm:$0xff]  ;;  %v35_v4 = vld [vmem:[%s602_s3 + $0x10] sm:$0xff]  ;;  %346 = vrcp.f32 %v353_v31  ;;  %vm99_vm4 = vcmask 261120   ;;  %vm327_vm11 = vcmask 523264   ;;  %vm333_vm12 = vcmask 7168  }
   0x2   :  { %v64_v1 = vld [vmem:[%s603_s4] sm:$0xff]  ;;  %54 = vmatpush.msra.mxu2 %v37_v0  ;;  %v138_v5 = vld [vmem:[%s605_s6 + $0x78] sm:$0xff]  ;;  %v137_v6 = vld [vmem:[%s605_s6 + $0x70] sm:$0xff] }
   0x3   :  { %v63_v2 = vld [vmem:[%s604_s1] sm:$0xff]  ;;  %85 = vmatpush.msra.mxu1 %v64_v1  ;;  %139 = vmatpush.msra.mxu3 %v138_v5  ;;  %v34_v7 = vld [vmem:[%s602_s3 + $0x8] sm:$0xff]  ;;  %v134_v12 = vld [vmem:[%s605_s6 + $0x58] sm:$0xff] }
   0x4   :  { %340 = vmatmul.msk.f32.vlgmr.msra.gmra.mxu1 %vm66_vm0, %v63_v2  ;;  %55 = vmatpush.msra.mxu2 %v36_v3  ;;  %v136_v8 = vld [vmem:[%s605_s6 + $0x68] sm:$0xff]  ;;  %v33_v9 = vld [vmem:[%s602_s3] sm:$0xff]  ;;  %v133_v13 = vld [vmem:[%s605_s6 + $0x50] sm:$0xff] }
   0x5   :  { %161 = vmatpush.msrb.mxu1 %v138_v5  ;;  %140 = vmatpush.msra.mxu3 %v137_v6  ;;  %v135_v10 = vld [vmem:[%s605_s6 + $0x60] sm:$0xff]  ;;  %v132_v14 = vld [vmem:[%s605_s6 + $0x48] sm:$0xff]  ;;  %v130_v16 = vld [vmem:[%s605_s6 + $0x38] sm:$0xff] }
   0x6   :  { %56 = vmatpush.msra.mxu2 %v35_v4  ;;  %v32_v11 = vld [vmem:[%s606_s0] sm:$0xff]  ;;  %v129_v17 = vld [vmem:[%s605_s6 + $0x30] sm:$0xff]  ;;  %v128_v18 = vld [vmem:[%s605_s6 + $0x28] sm:$0xff] }
   0x7   :  { %162 = vmatpush.msrb.mxu1 %v137_v6  ;;  %141 = vmatpush.msra.mxu3 %v136_v8  ;;  %v131_v15 = vld [vmem:[%s605_s6 + $0x40] sm:$0xff]  ;;  %v126_v20 = vld [vmem:[%s605_s6 + $0x18] sm:$0xff]  ;;  %v125_v21 = vld [vmem:[%s605_s6 + $0x10] sm:$0xff]  ;;  %v347_v32 = vpop.eup %346 }
   0x8   :  { %57 = vmatpush.msra.mxu2 %v34_v7  ;;  %v127_v19 = vld [vmem:[%s605_s6 + $0x20] sm:$0xff]  ;;  %v124_v22 = vld [vmem:[%s605_s6 + $0x8] sm:$0xff]  ;;  %v202_v33 = vmul.f32 16.0, %v347_v32  ;;  %vm206_vm3 = vweird.f32 %v347_v32  ;;  %v94_v40 = vld [vmem:[%s608_s5 + $0x18] sm:$0xff] }
   0x9   :  { %163 = vmatpush.msrb.mxu1 %v136_v8  ;;  %142 = vmatpush.msra.mxu3 %v135_v10  ;;  %v123_v23 = vld [vmem:[%s605_s6] sm:$0xff]  ;;  %v65_v24 = vld [vmem:[%s607_s8 + $0x8] ss:$0 sm:$0xff]  ;;  %s352_s6 = smov 112   ;;  %v93_v41 = vld [vmem:[%s608_s5 + $0x10] sm:$0xff] }
   0xa   :  { %58 = vmatpush.msra.mxu2 %v33_v9  ;;  %v38_v28 = vld [vmem:[%s607_s8] ss:$0 sm:$0xff]  ;;  %96 = vrot.lane.b32.xlu1 %v65_v24, %s352_s6  ;;  %v203_v34 = vsub.f32 1.0, %v202_v33  ;;  %v92_v43 = vld [vmem:[%s608_s5 + $0x8] sm:$0xff]  ;;  %v248_v53 = vld [vmem:[%s610_s7 + $0x78] sm:$0xff] }
   0xb   :  { %339 = vmatmul.msk.f32.vlgmr.msra.gmra.mxu2 %vm39_vm1, %v32_v11  ;;  %164 = vmatpush.msrb.mxu1 %v135_v10  ;;  %v91_v45 = vld [vmem:[%s608_s5] sm:$0xff]  ;;  %v250_v51 = vld [vmem:[%s610_s7 + $0x88] sm:$0xff]  ;;  %v247_v57 = vld [vmem:[%s610_s7 + $0x70] sm:$0xff] }
   0xc   :  { %143 = vmatpush.msra.mxu3 %v134_v12  ;;  %v204_v35 = vmul.f32 %v347_v32, %v203_v34  ;;  %115 = vmatpush.msrb.mxu2 %v94_v40  ;;  %v90_v47 = vld [vmem:[%s609_s2] sm:$0xff]  ;;  %v246_v58 = vld [vmem:[%s610_s7 + $0x68] sm:$0xff]  ;;  %v244_v60 = vld [vmem:[%s610_s7 + $0x58] sm:$0xff] }
   0xd   :  { %165 = vmatpush.msrb.mxu1 %v134_v12  ;;  %v249_v52 = vld [vmem:[%s610_s7 + $0x80] sm:$0xff]  ;;  %274 = vmatpush.msra.mxu0 %v248_v53  ;;  %v243_v62 = vld [vmem:[%s610_s7 + $0x50] sm:$0xff]  ;;  %v242_v0 = vld [vmem:[%s610_s7 + $0x48] sm:$0xff] }
   0xe   :  { %144 = vmatpush.msra.mxu3 %v133_v13  ;;  %v205_v36 = vadd.f32 %v347_v32, %v204_v35  ;;  %116 = vmatpush.msrb.mxu2 %v93_v41  ;;  %v245_v59 = vld [vmem:[%s610_s7 + $0x60] sm:$0xff]  ;;  %v240_v4 = vld [vmem:[%s610_s7 + $0x38] sm:$0xff]  ;;  %v239_v6 = vld [vmem:[%s610_s7 + $0x30] sm:$0xff] }
   0xf   :  { %166 = vmatpush.msrb.mxu1 %v133_v13  ;;  %275 = vmatpush.msra.mxu0 %v247_v57  ;;  %v241_v2 = vld [vmem:[%s610_s7 + $0x40] sm:$0xff]  ;;  %v297_v8 = vld [vmem:[%s610_s7 + $0xa8] sm:$0xff] }
  0x10   :  { %145 = vmatpush.msra.mxu3 %v132_v14  ;;  %v207_v37 = vsel %vm206_vm3, %v347_v32, %v205_v36  ;;  %117 = vmatpush.msrb.mxu2 %v92_v43  ;;  %v238_v9 = vld [vmem:[%s610_s7 + $0x28] sm:$0xff]  ;;  %v296_v12 = vld [vmem:[%s610_s7 + $0xa0] sm:$0xff] }
  0x11   :  { %167 = vmatpush.msrb.mxu1 %v132_v14  ;;  %276 = vmatpush.msra.mxu0 %v246_v58  ;;  %v227_v10 = vld [vmem:[%s607_s8 + $0x9] ss:$0 sm:$0xff]  ;;  %v237_v13 = vld [vmem:[%s610_s7 + $0x20] sm:$0xff] }
  0x12   :  { %146 = vmatpush.msra.mxu3 %v131_v15  ;;  %118 = vmatpush.msrb.mxu2 %v91_v45  ;;  %v194_v40 = vld [vmem:[%s607_s8 + $0x2] ss:$0 sm:$0xff] }
  0x13   :  { %168 = vmatpush.msrb.mxu1 %v131_v15  ;;  %341 = vmatmul.msk.f32.vlgmr.msrb.gmra.mxu2 %vm99_vm4, %v90_v47  ;;  %v295_v15 = vld [vmem:[%s610_s7 + $0x98] sm:$0xff] }
  0x14   :  { %147 = vmatpush.msra.mxu3 %v130_v16  ;;  %268 = vmatpush.msra.mxu2 %v250_v51 }
  0x15   :  { %169 = vmatpush.msrb.mxu1 %v130_v16  ;;  %277 = vmatpush.msra.mxu0 %v245_v59  ;;  %v236_v16 = vld [vmem:[%s610_s7 + $0x18] sm:$0xff] }
  0x16   :  { %148 = vmatpush.msra.mxu3 %v129_v17  ;;  %269 = vmatpush.msra.mxu2 %v249_v52 }
  0x17   :  { %170 = vmatpush.msrb.mxu1 %v129_v17  ;;  %278 = vmatpush.msra.mxu0 %v244_v60  ;;  %v229_v17 = vld [vmem:[%s607_s8 + $0xa] ss:$0 sm:$0xff] }
  0x18   :  { %149 = vmatpush.msra.mxu3 %v128_v18  ;;  %313 = vmatpush.msrb.mxu2 %v297_v8 }
  0x19   :  { %171 = vmatpush.msrb.mxu1 %v128_v18  ;;  %279 = vmatpush.msra.mxu0 %v243_v62 }
  0x1a   :  { %150 = vmatpush.msra.mxu3 %v127_v19  ;;  %314 = vmatpush.msrb.mxu2 %v296_v12 }
  0x1b   :  { %172 = vmatpush.msrb.mxu1 %v127_v19  ;;  %280 = vmatpush.msra.mxu0 %v242_v0  ;;  %v294_v19 = vld [vmem:[%s610_s7 + $0x90] sm:$0xff] }
  0x1c   :  { %151 = vmatpush.msra.mxu3 %v126_v20  ;;  %315 = vmatpush.msrb.mxu2 %v295_v15 }
  0x1d   :  { %173 = vmatpush.msrb.mxu1 %v126_v20  ;;  %281 = vmatpush.msra.mxu0 %v241_v2  ;;  %v235_v20 = vld [vmem:[%s610_s7 + $0x10] sm:$0xff] }
  0x1e   :  { %152 = vmatpush.msra.mxu3 %v125_v21  ;;  %316 = vmatpush.msrb.mxu2 %v294_v19 }
  0x1f   :  { %174 = vmatpush.msrb.mxu1 %v125_v21  ;;  %282 = vmatpush.msra.mxu0 %v240_v4 }
  0x20   :  { %153 = vmatpush.msra.mxu3 %v124_v22 }
  0x21   :  { %175 = vmatpush.msrb.mxu1 %v124_v22  ;;  %283 = vmatpush.msra.mxu0 %v239_v6  ;;  %v234_v22 = vld [vmem:[%s610_s7 + $0x8] sm:$0xff] }
  0x22   :  { %154 = vmatpush.msra.mxu3 %v123_v23 }
  0x23   :  { %176 = vmatpush.msrb.mxu1 %v123_v23  ;;  %284 = vmatpush.msra.mxu0 %v238_v9 }
  0x25   :  { %285 = vmatpush.msra.mxu0 %v237_v13 }
  0x27   :  { %286 = vmatpush.msra.mxu0 %v236_v16 }
  0x29   :  { %287 = vmatpush.msra.mxu0 %v235_v20 }
  0x2b   :  { %288 = vmatpush.msra.mxu0 %v234_v22 }
  0x7c   :  { %v97_v23 = vpop.permute.xlu1 %96 }
  0x81   :  { %v87_v25 = vpop.f32.mrf.mxu1 }
  0x82   :  { %v88_v26 = vadd.f32 %v87_v25, %v65_v24 }
  0x84   :  { %v198_v27 = vsel %vm197_vm2, %v88_v26, 0.0 }
  0x85   :  { %199 = vadd.xlane.f32.xlu0 %v198_v27 }
  0x8e   :  { %v60_v29 = vpop.f32.mrf.mxu2 }
  0x8f   :  { %v61_v30 = vadd.f32 %v60_v29, %v38_v28 }
  0x91   :  { %155 = vmatmul.f32.vlgmr.msra.gmra.mxu3 %v61_v30 }
  0x96   :  { %v120_v24 = vpop.f32.mrf.mxu2 }
  0x97   :  { %v121_v27 = vadd.f32 %v120_v24, %v97_v23 }
  0x99   :  { %v232_v28 = vmax.f32 %v121_v27, 0.0 }
  0xf8   :  { %v200_v38 = vpop.xlane.xlu0 %199 }
  0xf9   :  { %v208_v39 = vmul.f32 %v207_v37, %v200_v38  ;;  %v192_v38 = vld [vmem:[%s607_s8 + $0x1] ss:$0 sm:$0xff] }
  0xfb   :  { %v489_v42 = vsub.f32 %v88_v26, %v208_v39  ;;  %v233_v26 = vld [vmem:[%s610_s7] sm:$0xff] }
  0xfc   :  { %289 = vmatpush.msra.mxu0 %v233_v26 }
  0xfd   :  { %v210_v44 = vmul.f32 %v489_v42, %v489_v42 }
  0xff   :  { %v211_v46 = vsel %vm197_vm2, %v210_v44, 0.0 }
 0x100   :  { %212 = vadd.xlane.f32.xlu0 %v211_v46 }
 0x114   :  { %v156_v48 = vpop.f32.mrf.mxu3 }
 0x115   :  { %v504_v49 = vsub.f32 %v61_v30, %v156_v48  ;;  %v322_v48 = vld [vmem:[%s607_s8 + $0x3] ss:$0 sm:$0xff] }
 0x117   :  { %v160_v50 = vmul.f32 %v504_v49, %v504_v49 }
 0x119   :  { %177 = vmatmul.f32.vlgmr.msrb.gmra.mxu1 %v160_v50 }
 0x173   :  { %v213_v54 = vpop.xlane.xlu0 %212 }
 0x174   :  { %v214_v55 = vmul.f32 %v213_v54, %v207_v37 }
 0x176   :  { %v215_v56 = vadd.f32 1e-05, %v214_v55  ;;  %v331_v55 = vld [vmem:[%s607_s8 + $0x5] ss:$0 sm:$0xff] }
 0x178   :  { %348 = vrsqrt.f32 %v215_v56  ;;  %vm222_vm6 = vweird.f32 %v215_v56 }
 0x17e   :  { %v349_v61 = vpop.eup %348 }
 0x17f   :  { %v217_v63 = vmul.f32 %v349_v61, %v215_v56  ;;  %vm223_vm5 = vweird.f32 %v349_v61 }
 0x180   :  { %vm224_vm7 = vmor %vm222_vm6, %vm223_vm5 }
 0x181   :  { %v218_v1 = vmul.f32 %v349_v61, %v217_v63 }
 0x183   :  { %v219_v3 = vmul.f32 0.5, %v218_v1 }
 0x185   :  { %v220_v5 = vsub.f32 1.5, %v219_v3 }
 0x187   :  { %v221_v7 = vmul.f32 %v349_v61, %v220_v5 }
 0x189   :  { %v225_v11 = vsel %vm224_vm7, %v349_v61, %v221_v7 }
 0x18a   :  { %v226_v14 = vmul.f32 %v225_v11, %v489_v42 }
 0x18c   :  { %v228_v18 = vmul.f32 %v227_v10, %v226_v14 }
 0x18e   :  { %v230_v21 = vadd.f32 %v229_v17, %v228_v18 }
 0x190   :  { %v231_v25 = vmax.f32 %v230_v21, 0.0 }
 0x192   :  { %342 = vmatmul.msk.f32.vlgmr.msra.gmra.mxu2 %vm197_vm2, %v231_v25 }
 0x196   :  { %v178_v29 = vpop.f32.mrf.mxu1 }
 0x197   :  { %v179_v30 = vadd.f32 1e-05, %v178_v29 }
 0x199   :  { %350 = vrsqrt.f32 %v179_v30  ;;  %vm187_vm9 = vweird.f32 %v179_v30 }
 0x19a   :  { %343 = vmatmul.msk.f32.vlgmr.msrb.gmra.mxu2 %vm99_vm4, %v232_v28 }
 0x19f   :  { %v351_v31 = vpop.eup %350 }
 0x1a0   :  { %v182_v32 = vmul.f32 %v351_v31, %v179_v30  ;;  %vm188_vm8 = vweird.f32 %v351_v31 }
 0x1a1   :  { %vm189_vm10 = vmor %vm187_vm9, %vm188_vm8 }
 0x1a2   :  { %v183_v33 = vmul.f32 %v351_v31, %v182_v32 }
 0x1a4   :  { %v184_v34 = vmul.f32 0.5, %v183_v33 }
 0x1a6   :  { %v185_v35 = vsub.f32 1.5, %v184_v34 }
 0x1a8   :  { %v186_v36 = vmul.f32 %v351_v31, %v185_v35 }
 0x1aa   :  { %v190_v37 = vsel %vm189_vm10, %v351_v31, %v186_v36 }
 0x1ab   :  { %v191_v39 = vmul.f32 %v190_v37, %v504_v49  ;;  %v325_v49 = vld [vmem:[%s607_s8 + $0x4] ss:$0 sm:$0xff] }
 0x1ad   :  { %v193_v41 = vmul.f32 %v192_v38, %v191_v39 }
 0x1af   :  { %v195_v42 = vadd.f32 %v194_v40, %v193_v41 }
 0x1b1   :  { %v196_v43 = vmax.f32 %v195_v42, 0.0 }
 0x1b3   :  { %290 = vmatmul.f32.vlgmr.msra.gmra.mxu0 %v196_v43 }
 0x215   :  { %v271_v44 = vpop.f32.mrf.mxu2 }
 0x21d   :  { %v318_v46 = vpop.f32.mrf.mxu2 }
 0x230   :  { %v291_v45 = vpop.f32.mrf.mxu0 }
 0x231   :  { %v292_v47 = vadd.f32 %v291_v45, %v271_v44 }
 0x233   :  { %v321_v50 = vadd.f32 %v318_v46, %v292_v47 }
 0x235   :  { %v323_v51 = vadd.f32 %v322_v48, %v321_v50 }
 0x237   :  { %v324_v52 = vmax.f32 %v323_v51, 0.0 }
 0x239   :  { %v326_v53 = vmul.f32 %v325_v49, %v324_v52 }
 0x23b   :  { %v328_v54 = vsel %vm327_vm11, %v326_v53, 0.0 }
 0x23c   :  { %329 = vadd.xlane.f32.xlu1 %v328_v54 }
 0x2af   :  { %v330_v56 = vpop.xlane.xlu1 %329 }
 0x2b0   :  { %v332_v57 = vadd.f32 %v331_v55, %v330_v56 }
 0x2b2   :  { %334 = vst.msk [vmem:[%s611_s9] sm:$0xff] %vm333_vm12, %v332_v57 }

</bundles_post_ra>
